<compile_context>
chip_gen: v7x
topology: tpu7x:2x2x1
jax: 0.10.0
libtpu: 0.0.40
codegen_flags: <defaults>
</compile_context>

<pallas_src>
import functools

import jax
import jax.numpy as jnp
from jax.experimental import pallas as pl
from jax.experimental.pallas import tpu as pltpu


def _round_up(v, m):
    return ((v + m - 1) // m) * m


def _aori_kernel_general(a_ref, ah_ref, x_ref, y_ref, err_ref, *, compute_dtype):
    # y = A @ x   (MXU, f32 accumulation); y stays in VMEM for the second dot.
    y = jnp.dot(a_ref[...], x_ref[...].astype(compute_dtype),
                preferred_element_type=jnp.float32)
    y_ref[...] = y.astype(y_ref.dtype)
    # recon = AH @ y ; err = x - recon (residual in f32).
    recon = jnp.dot(ah_ref[...], y.astype(compute_dtype),
                    preferred_element_type=jnp.float32)
    # Re-read x from the (already resident) VMEM block instead of keeping the
    # pre-dot value live across both matmuls (lower vreg/scratch pressure).
    err_ref[...] = (x_ref[...].astype(jnp.float32) - recon).astype(err_ref.dtype)


# Contract lhs dim 0 with rhs dim 0  ==>  A^T @ y, without an explicit transpose.
_NT_DIMS = (((0,), (0,)), ((), ()))


def _aori_kernel_adjoint(a_ref, x_ref, y_ref, err_ref, *, compute_dtype):
    a = a_ref[...]
    y = jnp.dot(a, x_ref[...].astype(compute_dtype),
                preferred_element_type=jnp.float32)
    y_ref[...] = y.astype(y_ref.dtype)
    recon = jax.lax.dot_general(a, y.astype(compute_dtype), _NT_DIMS,
                                preferred_element_type=jnp.float32)
    err_ref[...] = (x_ref[...].astype(jnp.float32) - recon).astype(err_ref.dtype)


@functools.partial(jax.jit,
                   static_argnames=("ah_is_adjoint", "compute_dtype", "max_tb"))
def aori_forward(A, AH, x, *, ah_is_adjoint=False, compute_dtype=None, max_tb=512):
    M, N = A.shape
    assert AH.shape == (N, M), "AH must be (N, M)"
    Nx, B = x.shape
    assert Nx == N, "x must be (N, B)"

    if compute_dtype is None:
        compute_dtype = A.dtype
    compute_dtype = jnp.dtype(compute_dtype)

    lanes = 128
    max_tb = max(lanes, (int(max_tb) // lanes) * lanes)
    w_item = compute_dtype.itemsize
    s_item = jnp.dtype(x.dtype).itemsize
    n_weights = 1 if ah_is_adjoint else 2

    # Per-TensorCore VMEM capacity (fallback: v7x's 64 MiB).
    try:
        vmem_cap = int(getattr(pltpu.get_tpu_info(), "vmem_capacity_bytes",
                               64 << 20))
    except Exception:
        vmem_cap = 64 << 20

    def footprint(tb):
        weights = n_weights * M * N * w_item            # single-buffered A (+AH)
        streams = 2 * tb * (2 * N + M) * s_item         # double-buffered x, y, err
        return weights + streams

    # Largest 128-multiple column tile <= max_tb that fits the VMEM budget and
    # leaves >= 2 grid steps whenever B spans more than one lane tile (so the
    # pipeline / megacore actually engage).
    b_ceil = _round_up(B, lanes)
    budget = int(vmem_cap * 0.8)
    tb = lanes
    for cand in range(min(max_tb, b_ceil), lanes - 1, -lanes):
        if B > lanes and cand >= B:
            continue                      # would collapse the grid to one step
        if footprint(cand) <= budget:
            tb = cand
            break
    grid = ((B + tb - 1) // tb,)

    need = footprint(tb)
    vmem_limit = int(min(vmem_cap, max(2 * need + (4 << 20), 32 << 20)))

    cost = pl.CostEstimate(
        flops=4 * M * N * B,                              # two matmuls
        transcendentals=0,
        bytes_accessed=(n_weights * M * N * w_item
                        + (2 * N + M) * B * s_item),
    )

    A_c = A if A.dtype == compute_dtype else A.astype(compute_dtype)
    resident = pl.Buffered(1)   # constant index_map -> one DMA, one buffer

    if ah_is_adjoint:
        kernel = functools.partial(_aori_kernel_adjoint,
                                   compute_dtype=compute_dtype)
        in_specs = [
            pl.BlockSpec((M, N), lambda i: (0, 0), pipeline_mode=resident),  # A
            pl.BlockSpec((N, tb), lambda i: (0, i)),                          # x
        ]
        operands = (A_c, x)
    else:
        kernel = functools.partial(_aori_kernel_general,
                                   compute_dtype=compute_dtype)
        AH_c = AH if AH.dtype == compute_dtype else AH.astype(compute_dtype)
        in_specs = [
            pl.BlockSpec((M, N), lambda i: (0, 0), pipeline_mode=resident),  # A
            pl.BlockSpec((N, M), lambda i: (0, 0), pipeline_mode=resident),  # AH
            pl.BlockSpec((N, tb), lambda i: (0, i)),                          # x
        ]
        operands = (A_c, AH_c, x)

    y, err = pl.pallas_call(
        kernel,
        out_shape=(jax.ShapeDtypeStruct((M, B), x.dtype),   # y
                   jax.ShapeDtypeStruct((N, B), x.dtype)),  # err
        grid=grid,
        in_specs=in_specs,
        out_specs=[pl.BlockSpec((M, tb), lambda i: (0, i)),
                   pl.BlockSpec((N, tb), lambda i: (0, i))],
        compiler_params=pltpu.CompilerParams(
            dimension_semantics=("parallel",),
            vmem_limit_bytes=vmem_limit,
        ),
        cost_estimate=cost,
    )(*operands)
    return y, err


def aori_reference(A, AH, x):
    hp = jax.lax.Precision.HIGHEST
    y = jnp.matmul(A, x, precision=hp)
    recon = jnp.matmul(AH, y, precision=hp)
    return y, x - recon


if __name__ == "__main__":
    key = jax.random.PRNGKey(0)
    kA, kx, kx2 = jax.random.split(key, 3)

    # Small shapes consistent with the module: A (M, N), AH = A^T, x (N, B).
    M, N, B = 16, 32, 8
    A = jax.random.normal(kA, (M, N), dtype=jnp.float32) / jnp.sqrt(N)
    AH = A.T
    x = jax.random.normal(kx, (N, B), dtype=jnp.float32)

    y_ref, err_ref = aori_reference(A, AH, x)

    # 1) General path (arbitrary AH -- exact module semantics).
    y, err = aori_forward(A, AH, x)
    jax.block_until_ready((y, err))
    assert y.shape == (M, B) and err.shape == (N, B)
    assert jnp.allclose(y, y_ref, atol=1e-4, rtol=1e-4)
    assert jnp.allclose(err, err_ref, atol=1e-4, rtol=1e-4)

    # 2) AH == A^T fast path (single resident weight, transposed MXU contraction).
    y2, err2 = aori_forward(A, AH, x, ah_is_adjoint=True)
    jax.block_until_ready((y2, err2))
    assert jnp.allclose(y2, y_ref, atol=1e-4, rtol=1e-4)
    assert jnp.allclose(err2, err_ref, atol=1e-4, rtol=1e-4)

    # 3) Ragged multi-tile B (>= 2 grid steps, masked last column tile, no pad/crop).
    B2 = 200
    x2 = jax.random.normal(kx2, (N, B2), dtype=jnp.float32)
    y3_ref, err3_ref = aori_reference(A, AH, x2)
    y3, err3 = aori_forward(A, AH, x2)
    jax.block_until_ready((y3, err3))
    assert y3.shape == (M, B2) and err3.shape == (N, B2)
    assert jnp.allclose(y3, y3_ref, atol=1e-4, rtol=1e-4)
    assert jnp.allclose(err3, err3_ref, atol=1e-4, rtol=1e-4)

    # 4) bf16 matmul operands (f32 accumulation) -- loose tolerance by design.
    y4, err4 = aori_forward(A, AH, x, ah_is_adjoint=True,
                            compute_dtype=jnp.bfloat16)
    jax.block_until_ready((y4, err4))
    assert jnp.allclose(y4, y_ref, atol=1.5e-1, rtol=1e-1)
    assert jnp.allclose(err4, err_ref, atol=1.5e-1, rtol=1e-1)

    print("KERNEL_OK")
</pallas_src>

<mosaic_0001>
module attributes {stable_mosaic.version = 11 : i64} {
  func.func @_aori_kernel_general(%arg0: i32, %arg1: memref<16x32xf32, #tpu.memory_space<vmem>>, %arg2: memref<32x16xf32, #tpu.memory_space<vmem>>, %arg3: memref<32x128xf32, #tpu.memory_space<vmem>>, %arg4: memref<16x128xf32, #tpu.memory_space<vmem>>, %arg5: memref<32x128xf32, #tpu.memory_space<vmem>>) attributes {dimension_semantics = [#tpu.dimension_semantics<parallel>], iteration_bounds = array<i64: 1>, scalar_prefetch = 0 : i64, scratch_operands = 0 : i64, tpu.core_type = #tpu.core_type<tc>, window_params = [{pipeline_mode = #tpu.pipeline_mode<synchronous>, transform_indices = @transform_0, window_bounds = array<i64: 16, 32>}, {pipeline_mode = #tpu.pipeline_mode<synchronous>, transform_indices = @transform_1, window_bounds = array<i64: 32, 16>}, {transform_indices = @transform_2, window_bounds = array<i64: 32, 128>}, {transform_indices = @transform_3, window_bounds = array<i64: 16, 128>}, {transform_indices = @transform_4, window_bounds = array<i64: 32, 128>}]} {
    %c0 = arith.constant 0 : index
    %c0_0 = arith.constant 0 : index
    %0 = vector.load %arg1[%c0, %c0_0] : memref<16x32xf32, #tpu.memory_space<vmem>>, vector<16x32xf32>
    %c0_1 = arith.constant 0 : index
    %c0_2 = arith.constant 0 : index
    %1 = vector.load %arg3[%c0_1, %c0_2] : memref<32x128xf32, #tpu.memory_space<vmem>>, vector<32x128xf32>
    %cst = arith.constant dense<0.000000e+00> : vector<16x128xf32>
    %2 = tpu.matmul %0, %1, %cst {dimension_numbers = #tpu.dot_dimension_numbers<[1], [0], [0], [1], [0, 0, 1, 1], [], []>} : vector<16x32xf32>, vector<32x128xf32>, vector<16x128xf32> -> vector<16x128xf32>
    %c0_3 = arith.constant 0 : index
    %c0_4 = arith.constant 0 : index
    %3 = vector.load %arg4[%c0_3, %c0_4] : memref<16x128xf32, #tpu.memory_space<vmem>>, vector<16x128xf32>
    tpu.vector_store %arg4[%c0_3, %c0_4], %2 {strides = array<i32>} : memref<16x128xf32, #tpu.memory_space<vmem>>, vector<16x128xf32>,
    %c0_5 = arith.constant 0 : index
    %c0_6 = arith.constant 0 : index
    %4 = vector.load %arg2[%c0_5, %c0_6] : memref<32x16xf32, #tpu.memory_space<vmem>>, vector<32x16xf32>
    %cst_7 = arith.constant dense<0.000000e+00> : vector<32x128xf32>
    %5 = tpu.matmul %4, %2, %cst_7 {dimension_numbers = #tpu.dot_dimension_numbers<[1], [0], [0], [1], [0, 0, 1, 1], [], []>} : vector<32x16xf32>, vector<16x128xf32>, vector<32x128xf32> -> vector<32x128xf32>
    %c0_8 = arith.constant 0 : index
    %c0_9 = arith.constant 0 : index
    %6 = vector.load %arg3[%c0_8, %c0_9] : memref<32x128xf32, #tpu.memory_space<vmem>>, vector<32x128xf32>
    %7 = arith.subf %6, %5 : vector<32x128xf32>
    %c0_10 = arith.constant 0 : index
    %c0_11 = arith.constant 0 : index
    %8 = vector.load %arg5[%c0_10, %c0_11] : memref<32x128xf32, #tpu.memory_space<vmem>>, vector<32x128xf32>
    tpu.vector_store %arg5[%c0_10, %c0_11], %7 {strides = array<i32>} : memref<32x128xf32, #tpu.memory_space<vmem>>, vector<32x128xf32>,
    return
  }
  func.func @transform_0(%arg0: i32) -> (i32, i32) {
    %c0_i32 = arith.constant 0 : i32
    %c0_i32_0 = arith.constant 0 : i32
    %c0_i32_1 = arith.constant 0 : i32
    return %c0_i32, %c0_i32_0 : i32, i32
  }
  func.func @transform_1(%arg0: i32) -> (i32, i32) {
    %c0_i32 = arith.constant 0 : i32
    %c0_i32_0 = arith.constant 0 : i32
    %c0_i32_1 = arith.constant 0 : i32
    return %c0_i32, %c0_i32_0 : i32, i32
  }
  func.func @transform_2(%arg0: i32) -> (i32, i32) {
    %c0_i32 = arith.constant 0 : i32
    %c0_i32_0 = arith.constant 0 : i32
    return %c0_i32, %arg0 : i32, i32
  }
  func.func @transform_3(%arg0: i32) -> (i32, i32) {
    %c0_i32 = arith.constant 0 : i32
    %c0_i32_0 = arith.constant 0 : i32
    return %c0_i32, %arg0 : i32, i32
  }
  func.func @transform_4(%arg0: i32) -> (i32, i32) {
    %c0_i32 = arith.constant 0 : i32
    %c0_i32_0 = arith.constant 0 : i32
    return %c0_i32, %arg0 : i32, i32
  }
}

</mosaic_0001>

<bundles_post_ra>
// kernel: aori_forward.1
= control target key start
LH: loop header
LB: loop body
LE: loop exit
PB: predicated region body
PF: predicated region fallthrough
CT: control target
= control target key end

     0   :  { %vm22_vm0 = vcmask 261120   ;;  %vm110_vm1 = vcmask 130048   ;;  %s356_s2 = inlined_call_operand.vmem [shape: f32[32,8], index: 2, kind: input, shape index: {}]   ;;  %s357_s0 = inlined_call_operand.vmem [shape: f32[16,32], index: 0, kind: input, shape index: {}]   ;;  %s358_s1 = inlined_call_operand.vmem [shape: f32[32,16], index: 1, kind: input, shape index: {}]   ;;  %s359_s3 = inlined_call_operand.vmem [shape: f32[16,8], index: 3, kind: output, shape index: {0}]   ;;  %s360_s4 = inlined_call_operand.vmem [shape: f32[32,8], index: 4, kind: output, shape index: {1}]  }
   0x1   :  { %v18_v0 = vld [vmem:[%s356_s2] sm:$0xff]  ;;  %v19_v1 = vld [vmem:[%s356_s2 + $0x8] sm:$0xff]  ;;  %v20_v2 = vld [vmem:[%s356_s2 + $0x10] sm:$0xff] }
   0x2   :  { %v267_v3 = vpack.c.bf16 %v19_v1, %v18_v0  ;;  %v21_v4 = vld [vmem:[%s356_s2 + $0x18] sm:$0xff]  ;;  %v16_v5 = vld [vmem:[%s357_s0] sm:$0xff]  ;;  %v17_v7 = vld [vmem:[%s357_s0 + $0x8] sm:$0xff] }
   0x3   :  { %v271_v6 = vpack.c.bf16 %v21_v4, %v20_v2  ;;  %254 = vmatprep.mubr.msk.f32.mxu0 %vm22_vm0, %v16_v5  ;;  %v106_v8 = vld [vmem:[%s358_s1] sm:$0xff]  ;;  %v107_v12 = vld [vmem:[%s358_s1 + $0x8] sm:$0xff]  ;;  %v108_v13 = vld [vmem:[%s358_s1 + $0x10] sm:$0xff] }
   0x4   :  { %268 = vmatprep.subr.bf16.mxu0 %v267_v3  ;;  %261 = vmatprep.mubr.msk.f32.mxu1 %vm110_vm1, %v106_v8  ;;  %v109_v14 = vld [vmem:[%s358_s1 + $0x18] sm:$0xff] }
   0x5   :  { %270 = vmatpush3.bf16.msra.mxu0 %v267_v3 }
   0x6   :  { %272 = vmatprep.subr.bf16.mxu0 %v271_v6 }
   0x9   :  { %274 = vmatpush3.bf16.msra.mxu0 %v271_v6 }
   0xc   :  { %255 = vmatmul.mubr.msk.f32.vlgmr.msra.gmra.mrb[0].mxu0 %vm22_vm0, %v17_v7 }
  0xdf   :  { %v256_v9 = vpop.f32.mrb[0].mxu0 }
  0xe0   :  { %v95_v10 = vpop.f32.mrb[1].mxu0  ;;  %105 = vst [vmem:[%s359_s3 + $0x8] sm:$0xff] %v256_v9 }
  0xe1   :  { %104 = vst [vmem:[%s359_s3] sm:$0xff] %v95_v10  ;;  %v275_v11 = vpack.c.bf16 %v256_v9, %v95_v10 }
  0xe3   :  { %276 = vmatprep.subr.bf16.mxu1 %v275_v11 }
  0xe4   :  { %278 = vmatpush3.bf16.msra.mxu1 %v275_v11 }
  0xe7   :  { %262 = vmatmul.mubr.msk.f32.vlgmr.msra.gmra.mrb[0].mxu1 %vm110_vm1, %v107_v12 }
  0xe8   :  { %264 = vmatprep.mubr.msk.f32.mxu1 %vm110_vm1, %v108_v13 }
  0xeb   :  { %265 = vmatmul.mubr.msk.f32.gmra.mrb[2].mxu1 %vm110_vm1, %v109_v14 }
 0x1ba   :  { %v263_v15 = vpop.f32.mrb[0].mxu1 }
 0x1bb   :  { %v213_v16 = vsub.f32 %v19_v1, %v263_v15  ;;  %v189_v17 = vpop.f32.mrb[1].mxu1 }
 0x1bc   :  { %v212_v18 = vsub.f32 %v18_v0, %v189_v17 }
 0x1bd   :  { %217 = vst [vmem:[%s360_s4 + $0x8] sm:$0xff] %v213_v16 }
 0x1be   :  { %216 = vst [vmem:[%s360_s4] sm:$0xff] %v212_v18  ;;  %v266_v19 = vpop.f32.mrb[2].mxu1 }
 0x1bf   :  { %v215_v20 = vsub.f32 %v21_v4, %v266_v19  ;;  %v199_v21 = vpop.f32.mrb[3].mxu1 }
 0x1c0   :  { %v214_v22 = vsub.f32 %v20_v2, %v199_v21 }
 0x1c1   :  { %219 = vst [vmem:[%s360_s4 + $0x18] sm:$0xff] %v215_v20 }
 0x1c2   :  { %218 = vst [vmem:[%s360_s4 + $0x10] sm:$0xff] %v214_v22 }

</bundles_post_ra>
